<compile_context>
chip_gen: v5e
topology: v5e:2x2
jax: 0.10.0
libtpu: 0.0.40
codegen_flags: <defaults>
</compile_context>

<pallas_src>
import functools

import jax
import jax.numpy as jnp
from jax.experimental import pallas as pl
from jax.experimental.pallas import tpu as pltpu

MARGIN = 1.0        # VersusLearning(margin=1.0)
NORM_EPS = 1e-12    # F.normalize default eps
COS_EPS = 1e-8      # nn.CosineSimilarity default eps


def versus_kernel(p1_ref, p2_ref, out_ref, acc_ref, *, tile_rows, batch):
    step = pl.program_id(0)

    @pl.when(step == 0)
    def _():
        acc_ref[...] = jnp.zeros_like(acc_ref)

    p1 = p1_ref[...].astype(jnp.float32)
    p2 = p2_ref[...].astype(jnp.float32)

    # Three lane reductions; no normalized temporaries.
    sq1 = jnp.sum(p1 * p1, axis=-1, keepdims=True)          # [TB, 1]
    sq2 = jnp.sum(p2 * p2, axis=-1, keepdims=True)          # [TB, 1]
    dot = jnp.sum(p1 * p2, axis=-1, keepdims=True)          # [TB, 1]

    # F.normalize denominators: d = max(||x||, 1e-12)
    n1 = jnp.sqrt(sq1)
    n2 = jnp.sqrt(sq2)
    d1 = jnp.maximum(n1, NORM_EPS)
    d2 = jnp.maximum(n2, NORM_EPS)

    # cos = <p1n, p2n> / max(||p1n|| * ||p2n||, 1e-8)
    #     = (dot / (d1*d2)) / max((n1/d1)*(n2/d2), 1e-8)
    # Per-row epilogue is [TB,1] only -> exact divides are negligible cost.
    inv_dd = 1.0 / (d1 * d2)
    num = dot * inv_dd
    denom = jnp.maximum((n1 * n2) * inv_dd, COS_EPS)
    cos = num / denom

    hinge = jnp.maximum(MARGIN + cos, 0.0)                  # [TB, 1]

    # Mask rows past the true batch only when the last tile is ragged
    # (static Python check: tile_rows and batch are trace-time constants).
    if batch % tile_rows != 0:
        row = jax.lax.broadcasted_iota(jnp.int32, hinge.shape, 0) + step * tile_rows
        hinge = jnp.where(row < batch, hinge, 0.0)

    acc_ref[...] += jnp.sum(hinge, axis=0, keepdims=True)   # (1,1) accumulator

    @pl.when(step == pl.num_programs(0) - 1)
    def _():
        total = jnp.sum(acc_ref[...])
        out_ref[0, 0] = total * (1.0 / batch)


def _pick_tile_rows(B, D, itemsize, max_rows=None):
    """Rows per tile so 2 inputs x 2 pipeline buffers fit ~12 MiB scoped VMEM."""
    budget_per_block = 3 * 1024 * 1024                      # bytes per input block
    rows = budget_per_block // max(1, D * itemsize)
    if max_rows is not None:
        rows = min(rows, max_rows)
    rows = max(8, (rows // 8) * 8)                          # keep sublane multiple of 8
    if rows >= B:
        return B                                            # single full-array block
    return rows


def versus_learning(p1, p2, *, max_block_rows=None):
    """p1, p2: [B, D] -> scalar loss (float32)."""
    B, D = p1.shape
    TB = _pick_tile_rows(B, D, jnp.dtype(p1.dtype).itemsize, max_block_rows)
    grid = (pl.cdiv(B, TB),)

    kernel = functools.partial(versus_kernel, tile_rows=TB, batch=B)

    out = pl.pallas_call(
        kernel,
        out_shape=jax.ShapeDtypeStruct((1, 1), jnp.float32),
        grid=grid,
        in_specs=[
            pl.BlockSpec((TB, D), lambda i: (i, 0)),
            pl.BlockSpec((TB, D), lambda i: (i, 0)),
        ],
        out_specs=pl.BlockSpec(memory_space=pltpu.SMEM),
        scratch_shapes=[pltpu.VMEM((1, 1), jnp.float32)],
        compiler_params=pltpu.CompilerParams(
            dimension_semantics=("arbitrary",),
        ),
    )(p1, p2)
    return out[0, 0]


def versus_learning_ref(p1, p2):
    """Pure-JAX reference mirroring the literal PyTorch semantics."""
    n1 = jnp.maximum(jnp.linalg.norm(p1, axis=-1, keepdims=True), NORM_EPS)
    n2 = jnp.maximum(jnp.linalg.norm(p2, axis=-1, keepdims=True), NORM_EPS)
    p1n, p2n = p1 / n1, p2 / n2
    dot = jnp.sum(p1n * p2n, axis=-1)
    denom = jnp.maximum(
        jnp.linalg.norm(p1n, axis=-1) * jnp.linalg.norm(p2n, axis=-1), COS_EPS
    )
    cos = dot / denom
    return jnp.mean(jnp.maximum(MARGIN + cos, 0.0))


if __name__ == "__main__":
    key = jax.random.PRNGKey(0)
    k1, k2, k3, k4 = jax.random.split(key, 4)

    # Small case: single tile, whole problem in one block.
    B, D = 8, 128
    p1 = jax.random.normal(k1, (B, D), dtype=jnp.float32)
    p2 = jax.random.normal(k2, (B, D), dtype=jnp.float32)

    loss = jax.block_until_ready(versus_learning(p1, p2))
    ref = jax.block_until_ready(versus_learning_ref(p1, p2))
    assert jnp.isfinite(loss), "non-finite loss"
    assert abs(float(loss) - float(ref)) < 1e-5, (float(loss), float(ref))

    # Tiled + ragged case: force TB=16 so grid=3 with a partial last tile.
    Bt, Dt = 40, 128
    q1 = jax.random.normal(k3, (Bt, Dt), dtype=jnp.float32)
    q2 = jax.random.normal(k4, (Bt, Dt), dtype=jnp.float32)

    loss_t = jax.block_until_ready(versus_learning(q1, q2, max_block_rows=16))
    ref_t = jax.block_until_ready(versus_learning_ref(q1, q2))
    assert jnp.isfinite(loss_t), "non-finite tiled loss"
    assert abs(float(loss_t) - float(ref_t)) < 1e-5, (float(loss_t), float(ref_t))

    # Tiled, evenly divisible case: exercises the mask-free fast path.
    Be, De = 64, 128
    r1 = jax.random.normal(k1, (Be, De), dtype=jnp.float32)
    r2 = jax.random.normal(k4, (Be, De), dtype=jnp.float32)

    loss_e = jax.block_until_ready(versus_learning(r1, r2, max_block_rows=16))
    ref_e = jax.block_until_ready(versus_learning_ref(r1, r2))
    assert jnp.isfinite(loss_e), "non-finite even-tiled loss"
    assert abs(float(loss_e) - float(ref_e)) < 1e-5, (float(loss_e), float(ref_e))

    print("KERNEL_OK")
</pallas_src>

<mosaic_0001>
module attributes {stable_mosaic.version = 11 : i64} {
  func.func @versus_kernel(%arg0: i32, %arg1: memref<8x128xf32, #tpu.memory_space<vmem>>, %arg2: memref<8x128xf32, #tpu.memory_space<vmem>>, %arg3: memref<1x1xf32, #tpu.memory_space<smem>>, %arg4: memref<1x1xf32, #tpu.memory_space<vmem>>) attributes {dimension_semantics = [#tpu.dimension_semantics<arbitrary>], iteration_bounds = array<i64: 1>, scalar_prefetch = 0 : i64, scratch_operands = 1 : i64, tpu.core_type = #tpu.core_type<tc>, window_params = [{transform_indices = @transform_0, window_bounds = array<i64: 8, 128>}, {transform_indices = @transform_1, window_bounds = array<i64: 8, 128>}, {transform_indices = @transform_2, window_bounds = array<i64: 1, 1>}]} {
    %c0_i32 = arith.constant 0 : i32
    %0 = arith.cmpi eq, %arg0, %c0_i32 : i32
    %1 = arith.extui %0 : i1 to i32
    %c0_i32_0 = arith.constant 0 : i32
    %2 = arith.cmpi ne, %1, %c0_i32_0 : i32
    scf.if %2 {
      %cst_19 = arith.constant 0.000000e+00 : f32
      %41 = vector.broadcast %cst_19 : f32 to vector<1x1xf32>
      %c0_20 = arith.constant 0 : index
      %c0_21 = arith.constant 0 : index
      %42 = vector.load %arg4[%c0_20, %c0_21] : memref<1x1xf32, #tpu.memory_space<vmem>>, vector<1x1xf32>
      tpu.vector_store %arg4[%c0_20, %c0_21], %41 {strides = array<i32>} : memref<1x1xf32, #tpu.memory_space<vmem>>, vector<1x1xf32>,
    } else {
    }
    %c0 = arith.constant 0 : index
    %c0_1 = arith.constant 0 : index
    %3 = vector.load %arg1[%c0, %c0_1] : memref<8x128xf32, #tpu.memory_space<vmem>>, vector<8x128xf32>
    %c0_2 = arith.constant 0 : index
    %c0_3 = arith.constant 0 : index
    %4 = vector.load %arg2[%c0_2, %c0_3] : memref<8x128xf32, #tpu.memory_space<vmem>>, vector<8x128xf32>
    %5 = arith.mulf %3, %3 : vector<8x128xf32>
    %cst = arith.constant dense<0.000000e+00> : vector<8xf32>
    %6 = vector.multi_reduction <add>, %5, %cst [1] : vector<8x128xf32> to vector<8xf32>
    %7 = vector.shape_cast %6 : vector<8xf32> to vector<8x1xf32>
    %8 = arith.mulf %4, %4 : vector<8x128xf32>
    %cst_4 = arith.constant dense<0.000000e+00> : vector<8xf32>
    %9 = vector.multi_reduction <add>, %8, %cst_4 [1] : vector<8x128xf32> to vector<8xf32>
    %10 = vector.shape_cast %9 : vector<8xf32> to vector<8x1xf32>
    %11 = arith.mulf %3, %4 : vector<8x128xf32>
    %cst_5 = arith.constant dense<0.000000e+00> : vector<8xf32>
    %12 = vector.multi_reduction <add>, %11, %cst_5 [1] : vector<8x128xf32> to vector<8xf32>
    %13 = vector.shape_cast %12 : vector<8xf32> to vector<8x1xf32>
    %14 = math.sqrt %7 : vector<8x1xf32>
    %15 = math.sqrt %10 : vector<8x1xf32>
    %cst_6 = arith.constant 9.99999996E-13 : f32
    %16 = vector.broadcast %cst_6 : f32 to vector<8x1xf32>
    %17 = arith.maximumf %14, %16 : vector<8x1xf32>
    %cst_7 = arith.constant 9.99999996E-13 : f32
    %18 = vector.broadcast %cst_7 : f32 to vector<8x1xf32>
    %19 = arith.maximumf %15, %18 : vector<8x1xf32>
    %20 = arith.mulf %17, %19 : vector<8x1xf32>
    %cst_8 = arith.constant 1.000000e+00 : f32
    %21 = vector.broadcast %cst_8 : f32 to vector<8x1xf32>
    %22 = arith.divf %21, %20 : vector<8x1xf32>
    %23 = arith.mulf %13, %22 : vector<8x1xf32>
    %24 = arith.mulf %14, %15 : vector<8x1xf32>
    %25 = arith.mulf %24, %22 : vector<8x1xf32>
    %cst_9 = arith.constant 9.99999993E-9 : f32
    %26 = vector.broadcast %cst_9 : f32 to vector<8x1xf32>
    %27 = arith.maximumf %25, %26 : vector<8x1xf32>
    %28 = arith.divf %23, %27 : vector<8x1xf32>
    %cst_10 = arith.constant 1.000000e+00 : f32
    %29 = vector.broadcast %cst_10 : f32 to vector<8x1xf32>
    %30 = arith.addf %29, %28 : vector<8x1xf32>
    %cst_11 = arith.constant 0.000000e+00 : f32
    %31 = vector.broadcast %cst_11 : f32 to vector<8x1xf32>
    %32 = arith.maximumf %30, %31 : vector<8x1xf32>
    %c0_12 = arith.constant 0 : index
    %c0_13 = arith.constant 0 : index
    %33 = vector.load %arg4[%c0_12, %c0_13] : memref<1x1xf32, #tpu.memory_space<vmem>>, vector<1x1xf32>
    %cst_14 = arith.constant dense<0.000000e+00> : vector<1xf32>
    %34 = vector.multi_reduction <add>, %32, %cst_14 [0] : vector<8x1xf32> to vector<1xf32>
    %35 = vector.shape_cast %34 : vector<1xf32> to vector<1x1xf32>
    %36 = arith.addf %33, %35 : vector<1x1xf32>
    %c0_15 = arith.constant 0 : index
    %c0_16 = arith.constant 0 : index
    %37 = vector.load %arg4[%c0_15, %c0_16] : memref<1x1xf32, #tpu.memory_space<vmem>>, vector<1x1xf32>
    tpu.vector_store %arg4[%c0_15, %c0_16], %36 {strides = array<i32>} : memref<1x1xf32, #tpu.memory_space<vmem>>, vector<1x1xf32>,
    %c0_i32_17 = arith.constant 0 : i32
    %38 = arith.cmpi eq, %arg0, %c0_i32_17 : i32
    %39 = arith.extui %38 : i1 to i32
    %c0_i32_18 = arith.constant 0 : i32
    %40 = arith.cmpi ne, %39, %c0_i32_18 : i32
    scf.if %40 {
      %c0_19 = arith.constant 0 : index
      %c0_20 = arith.constant 0 : index
      %41 = vector.load %arg4[%c0_19, %c0_20] : memref<1x1xf32, #tpu.memory_space<vmem>>, vector<1x1xf32>
      %42 = vector.shape_cast %41 : vector<1x1xf32> to vector<1x1x1xf32>
      %cst_21 = arith.constant dense<0.000000e+00> : vector<1xf32>
      %43 = vector.multi_reduction <add>, %42, %cst_21 [1, 2] : vector<1x1x1xf32> to vector<1xf32>
      %44 = vector.shape_cast %43 : vector<1xf32> to vector<1x1x1xf32>
      %45 = vector.extract %44[0, 0, 0] : f32 from vector<1x1x1xf32>
      %cst_22 = arith.constant 1.250000e-01 : f32
      %46 = arith.mulf %45, %cst_22 : f32
      %c0_23 = arith.constant 0 : index
      %c0_24 = arith.constant 0 : index
      %47 = memref.load %arg3[%c0_23, %c0_24] : memref<1x1xf32, #tpu.memory_space<smem>>
      memref.store %46, %arg3[%c0_23, %c0_24] : memref<1x1xf32, #tpu.memory_space<smem>>
    } else {
    }
    return
  }
  func.func @transform_0(%arg0: i32) -> (i32, i32) {
    %c0_i32 = arith.constant 0 : i32
    %c0_i32_0 = arith.constant 0 : i32
    return %arg0, %c0_i32 : i32, i32
  }
  func.func @transform_1(%arg0: i32) -> (i32, i32) {
    %c0_i32 = arith.constant 0 : i32
    %c0_i32_0 = arith.constant 0 : i32
    return %arg0, %c0_i32 : i32, i32
  }
  func.func @transform_2(%arg0: i32) -> (i32, i32) {
    %c0_i32 = arith.constant 0 : i32
    %c0_i32_0 = arith.constant 0 : i32
    %c0_i32_1 = arith.constant 0 : i32
    return %c0_i32, %c0_i32_0 : i32, i32
  }
}

</mosaic_0001>

<bundles_post_ra>
// kernel: tpu_custom_call.1
= control target key start
LH: loop header
LB: loop body
LE: loop exit
PB: predicated region body
PF: predicated region fallthrough
CT: control target
= control target key end

     0   :  { %7 = vsyncpa [#allocation4], 0  ;;  %s266_s0 = inlined_call_operand.hbm [shape: f32[8,128], index: 0, kind: input, shape index: {}]   ;;  %s267_s1 = inlined_call_operand.hbm [shape: f32[8,128], index: 1, kind: input, shape index: {}]   ;;  %s268_s2 = inlined_call_operand.hbm [shape: f32[1,1], index: 2, kind: output, shape index: {}]  }
   0x1   :  { %8 = vsyncpa [#allocation7], 0 }
   0x2   :  { %9 = vsyncpa [#allocation5], 0  ;;  %s15_s11 = sshll.u32 %s266_s0, 4  ;;  %s236_s12 = smov [#allocation3]   ;;  %s16_s11 = int_to_ptr.hbm [resolvable:$true] %s15_s11 }
   0x3   :  { %s17_s13 = sshll.u32 %s236_s12, 4  ;;  %s26_s16 = sshll.u32 %s267_s1, 4  ;;  %s18_s13 = int_to_ptr.vmem [resolvable:$true] %s17_s13  ;;  %s27_s16 = int_to_ptr.hbm [resolvable:$true] %s26_s16 }
   0x4   :  { %20 = dma.hbm_to_vmem [thread:$0]  %s16_s11, 128, %s18_s13, [#allocation4]  }
   0x5   :  { %s237_s17 = smov [#allocation6]  }
   0x6   :  { %s28_s18 = sshll.u32 %s237_s17, 4  ;;  %s29_s18 = int_to_ptr.vmem [resolvable:$true] %s28_s18 }
   0x7   :  { %31 = dma.hbm_to_vmem [thread:$0]  %s27_s16, 128, %s29_s18, [#allocation7]  }
   0x8   :  { %230 = dma.done.wait [#allocation4], 128  }
   0x9   :  { %231 = vsyncadd [#allocation4], 4294967168 }
   0xa   :  { %232 = dma.done.wait [#allocation7], 128  }
   0xb   :  { %233 = vsyncadd [#allocation7], 4294967168  ;;  %vm44_vm0 = vcmask 0   ;;  %v238_v0 = vmov 0.0   ;;  %v46_v1 = vld [vmem:[#allocation3] sm:$0xff]  ;;  %v47_v2 = vld [vmem:[#allocation6] sm:$0xff] }
   0xc   :  { %45 = vst.msk [vmem:[#allocation2] sm:$0x1] %vm44_vm0, %v238_v0  ;;  %v48_v3 = vmul.f32 %v46_v1, %v46_v1  ;;  %v54_v4 = vmul.f32 %v47_v2, %v46_v1  ;;  %v51_v5 = vmul.f32 %v47_v2, %v47_v2  ;;  %s144_s19 = sshll.u32 %s268_s2, 4  ;;  %s239_s22 = smov [#allocation8]   ;;  %s145_s19 = int_to_ptr.hbm [resolvable:$true] %s144_s19 }
   0xe   :  { %49 = vadd.xlane.f32.xlu0 %v48_v3  ;;  %55 = vadd.xlane.f32.xlu1 %v54_v4 }
  0x13   :  { %v120_v0 = vld [vmem:[#allocation2] sm:$0x1] }
  0x16   :  { %52 = vadd.xlane.f32.xlu0 %v51_v5 }
  0x81   :  { %v50_v6 = vpop.xlane.xlu0 %49  ;;  %v56_v50 = vpop.xlane.xlu1 %55 }
  0x82   :  { %162 = vrsqrt.f32 %v50_v6  ;;  %vm64_vm1 = vcmp.eq.f32.partialorder %v50_v6, inf  ;;  %v67_v22 = vand.u32 2147483648, %v50_v6  ;;  %vm66_vm2 = vcmp.eq.f32.partialorder %v50_v6, 0.0 }
  0x88   :  { %v163_v7 = vpop.eup %162 }
  0x89   :  { %v58_v8 = vmul.f32 %v163_v7, %v50_v6  ;;  %v53_v9 = vpop.xlane.xlu0 %52 }
  0x8a   :  { %164 = vrsqrt.f32 %v53_v9  ;;  %vm76_vm3 = vcmp.eq.f32.partialorder %v53_v9, inf  ;;  %v79_v25 = vand.u32 2147483648, %v53_v9  ;;  %vm78_vm4 = vcmp.eq.f32.partialorder %v53_v9, 0.0 }
  0x8b   :  { %v59_v10 = vmul.f32 %v163_v7, %v58_v8 }
  0x8d   :  { %v60_v11 = vmul.f32 0.5, %v59_v10 }
  0x8f   :  { %v61_v12 = vsub.f32 1.5, %v60_v11 }
  0x90   :  { %v165_v13 = vpop.eup %164 }
  0x91   :  { %v70_v14 = vmul.f32 %v165_v13, %v53_v9  ;;  %v62_v15 = vmul.f32 %v163_v7, %v61_v12 }
  0x93   :  { %v71_v16 = vmul.f32 %v165_v13, %v70_v14  ;;  %v63_v18 = vmul.f32 %v62_v15, %v50_v6 }
  0x95   :  { %v72_v17 = vmul.f32 0.5, %v71_v16  ;;  %v65_v21 = vsel %vm64_vm1, %v50_v6, %v63_v18 }
  0x96   :  { %v68_v24 = vsel %vm66_vm2, %v67_v22, %v65_v21 }
  0x97   :  { %v73_v19 = vsub.f32 1.5, %v72_v17  ;;  %v81_v28 = vmax.f32 %v68_v24, 1e-12 }
  0x99   :  { %v74_v20 = vmul.f32 %v165_v13, %v73_v19 }
  0x9b   :  { %v75_v23 = vmul.f32 %v74_v20, %v53_v9 }
  0x9d   :  { %v77_v26 = vsel %vm76_vm3, %v53_v9, %v75_v23 }
  0x9e   :  { %v80_v27 = vsel %vm78_vm4, %v79_v25, %v77_v26 }
  0x9f   :  { %v82_v29 = vmax.f32 %v80_v27, 1e-12  ;;  %v100_v40 = vmul.f32 %v80_v27, %v68_v24 }
  0xa1   :  { %v83_v30 = vmul.f32 %v82_v29, %v81_v28 }
  0xa3   :  { %166 = vrcp.f32 %v83_v30  ;;  %v95_v34 = vand.u32 2147483648, %v83_v30  ;;  %v93_v36 = vand.u32 2147483647, %v83_v30  ;;  %vm89_vm6 = vweird.f32 %v83_v30 }
  0xa5   :  { %v96_v38 = vor.u32 1.1754944e-38, %v95_v34  ;;  %vm94_vm8 = vcmp.eq.f32.partialorder %v93_v36, 8.507059e+37 }
  0xa9   :  { %v167_v31 = vpop.eup %166 }
  0xaa   :  { %v85_v32 = vmul.f32 %v167_v31, %v83_v30  ;;  %vm90_vm5 = vweird.f32 %v167_v31 }
  0xab   :  { %vm91_vm7 = vmor %vm89_vm6, %vm90_vm5 }
  0xac   :  { %v86_v33 = vsub.f32 1.0, %v85_v32 }
  0xae   :  { %v87_v35 = vmul.f32 %v167_v31, %v86_v33 }
  0xb0   :  { %v88_v37 = vadd.f32 %v167_v31, %v87_v35 }
  0xb2   :  { %v92_v39 = vsel %vm91_vm7, %v167_v31, %v88_v37 }
  0xb3   :  { %v97_v41 = vsel %vm94_vm8, %v96_v38, %v92_v39 }
  0xb4   :  { %v101_v42 = vmul.f32 %v100_v40, %v97_v41  ;;  %v99_v53 = vmul.f32 %v97_v41, %v56_v50 }
  0xb6   :  { %v102_v43 = vmax.f32 %v101_v42, 1e-08 }
  0xb8   :  { %168 = vrcp.f32 %v102_v43  ;;  %v114_v47 = vand.u32 2147483648, %v102_v43  ;;  %v112_v49 = vand.u32 2147483647, %v102_v43  ;;  %vm108_vm10 = vweird.f32 %v102_v43 }
  0xba   :  { %v115_v52 = vor.u32 1.1754944e-38, %v114_v47  ;;  %vm113_vm12 = vcmp.eq.f32.partialorder %v112_v49, 8.507059e+37 }
  0xbe   :  { %v169_v44 = vpop.eup %168 }
  0xbf   :  { %v104_v45 = vmul.f32 %v169_v44, %v102_v43  ;;  %vm109_vm9 = vweird.f32 %v169_v44 }
  0xc0   :  { %vm110_vm11 = vmor %vm108_vm10, %vm109_vm9 }
  0xc1   :  { %v105_v46 = vsub.f32 1.0, %v104_v45 }
  0xc3   :  { %v106_v48 = vmul.f32 %v169_v44, %v105_v46 }
  0xc5   :  { %v107_v51 = vadd.f32 %v169_v44, %v106_v48 }
  0xc7   :  { %v111_v54 = vsel %vm110_vm11, %v169_v44, %v107_v51 }
  0xc8   :  { %v116_v55 = vsel %vm113_vm12, %v115_v52, %v111_v54 }
  0xc9   :  { %v117_v56 = vmul.f32 %v116_v55, %v99_v53 }
  0xcb   :  { %v118_v57 = vadd.f32 1.0, %v117_v56 }
  0xcd   :  { %v119_v58 = vmax.f32 %v118_v57, 0.0 }
  0xcf   :  { %v121_v59 = vrot.slane %v119_v58, 4 }
  0xd1   :  { %v122_v60 = vadd.f32 %v121_v59, %v119_v58 }
  0xd3   :  { %v123_v61 = vrot.slane %v122_v60, 2 }
  0xd5   :  { %v124_v62 = vadd.f32 %v123_v61, %v122_v60 }
  0xd7   :  { %v125_v63 = vrot.slane %v124_v62, 1 }
  0xd9   :  { %v126_v1 = vadd.f32 %v125_v63, %v124_v62 }
  0xdb   :  { %v127_v2 = vadd.f32 %v126_v1, %v120_v0 }
  0xdd   :  { %129 = vst.msk [vmem:[#allocation2] sm:$0x1] %vm44_vm0, %v127_v2 }
  0xe4   :  { %v133_v3 = vld [vmem:[#allocation2] sm:$0x1] }
  0xe5   :  { %156 = vpush %v133_v3 }
 0x116   :  { %s157_s20 = spop %156 }
 0x117   :  { %s136_s21 = smul.f32 0.125, %s157_s20 }
 0x119   :  { %138 = sst [smem:[#allocation8]] %s136_s21 }
 0x11a   :  { %147 = dma.smem_to_hbm %s239_s22, 16, %s145_s19, [#allocation5]  }
 0x11b   :  { %234 = dma.done.wait [#allocation5], 16  }
 0x11c   :  { %235 = vsyncadd [#allocation5], 4294967280 }
 0x11d   :  { %152 = sfence }
 0x11e   :  { %153 = vsyncpa [#allocation4], 1 }
 0x11f   :  { %154 = vsyncpa [#allocation7], 1 }
 0x120   :  { %155 = vsyncpa [#allocation5], 1 }

</bundles_post_ra>
